<compile_context>
chip_gen: v5e
topology: v5e:2x2
jax: 0.10.0
libtpu: 0.0.40
codegen_flags: <defaults>
</compile_context>

<pallas_src>
import functools

import jax
import jax.numpy as jnp
from jax.experimental import pallas as pl
from jax.experimental.pallas import tpu as pltpu


def _round_up(v, m):
    return ((v + m - 1) // m) * m


def _pow2_mult_128(v):
    """Largest 128 * 2^k that is <= max(v, 128)."""
    r = 128
    while r * 2 <= v:
        r *= 2
    return r


def _vmem_budget():
    """(physical VMEM bytes, usable budget with headroom for compiler scratch)."""
    phys = 128 * 1024 * 1024
    try:
        info = pltpu.get_tpu_info()
        cap = int(getattr(info, "vmem_capacity_bytes", 0) or 0)
        if cap > 0:
            phys = cap
    except Exception:
        pass
    budget = min(int(phys * 0.82), phys - (8 << 20))
    return phys, max(budget, 16 << 20)


def _plan(n, d_pad, esz, tm_req, tk_req, budget, force_stream):
    """Pick resident-A vs streamed-A tiling that fits the VMEM budget."""

    def fixed_bytes(n_pad, tm):
        return (2 * n_pad * d_pad * esz      # activation ping-pong (resident)
                + tm * d_pad * 4             # f32 accumulator
                + 2 * d_pad * d_pad * esz    # W_l double buffer
                + 2 * 8 * d_pad * 4          # b_l double buffer (sublane padded)
                + 2 * tm * d_pad * 4)        # f32 output tile double buffer

    tm_cap = _pow2_mult_128(max(tm_req, 128))
    tk_cap = _pow2_mult_128(max(tk_req, 128))

    if not force_stream:
        # Resident-A candidate: minimal 128-padding, tm = largest pow2*128
        # divisor of n_pad not exceeding the request, full contraction (nk=1).
        n_pad = _round_up(n, 128)
        tm = 128
        while tm * 2 <= tm_cap and n_pad % (tm * 2) == 0:
            tm *= 2
        resident_bytes = (n_pad * n_pad * esz        # A resident (single copy)
                          + tm * n_pad * esz         # margin: A-row slice copy
                          + fixed_bytes(n_pad, tm))
        if resident_bytes <= budget:
            return dict(resident=True, tm=tm, tk=n_pad, n_pad=n_pad)

    # Streamed-A fallback: (tm, tk) tiles of A, shrink until the plan fits.
    tm, tk = tm_cap, tk_cap
    while True:
        n_pad = _round_up(n, max(tm, tk))
        total = 3 * tm * tk * esz + fixed_bytes(n_pad, tm)
        if total <= budget or (tm == 128 and tk == 128):
            break
        if tk >= tm and tk > 128:
            tk //= 2
        elif tm > 128:
            tm //= 2
        else:
            tk //= 2
    # TODO(synk): if even the 128x128 streamed plan exceeds the budget the
    # resident (2*n_pad, d_pad) activation itself needs tiling; not implemented.
    return dict(resident=False, tm=tm, tk=tk, n_pad=n_pad)


def _streamed_a_spec(tm, tk):
    idx = lambda l, i, k: (i, k)
    try:
        # Triple-buffer A so the HBM stream stays busy across the epilogue.
        return pl.BlockSpec((tm, tk), idx, pipeline_mode=pl.Buffered(3))
    except TypeError:
        return pl.BlockSpec((tm, tk), idx)


def _gcn_kernel(a_ref, x_hbm_ref, w_ref, b_ref, o_ref, acc_ref, act_ref, *rest,
                tm, tk, n_pad, num_layers, resident_a):
    """Fused GCN stack. grid = (layer, output-row tile, contraction tile)."""
    if resident_a:
        a_vmem_ref, dma_sem = rest
    else:
        (dma_sem,) = rest
        a_vmem_ref = None

    l = pl.program_id(0)          # layer index            (sequential)
    i = pl.program_id(1)          # output-row tile        (shares act scratch)
    k = pl.program_id(2)          # contraction (node) tile (reduction)
    nk = pl.num_programs(2)

    # One-time DMAs at the very first grid step:
    #   * x -> activation slot 0 (read from HBM exactly once, no standing buffer)
    #   * A -> resident VMEM scratch (single copy, no double buffering)
    @pl.when((l == 0) & (i == 0) & (k == 0))
    def _():
        x_cp = pltpu.make_async_copy(x_hbm_ref, act_ref.at[pl.ds(0, n_pad)],
                                     dma_sem.at[0])
        x_cp.start()
        if resident_a:
            a_cp = pltpu.make_async_copy(a_ref, a_vmem_ref, dma_sem.at[1])
            a_cp.start()
            a_cp.wait()
        x_cp.wait()

    rs = l & 1          # slot holding this layer's input activation
    ws = (l + 1) & 1    # slot receiving this layer's output activation

    @pl.when(k == 0)
    def _():
        acc_ref[...] = jnp.zeros_like(acc_ref)

    # Partial product over the node axis:  acc += A[i, k] @ act[k]   (MXU, f32)
    if resident_a:
        a_tile = a_vmem_ref[pl.ds(pl.multiple_of(i * tm, tm), tm), :]
    else:
        a_tile = a_ref[...]
    act_k = act_ref[pl.ds(pl.multiple_of(rs * n_pad + k * tk, tk), tk), :]
    acc_ref[...] += jnp.dot(a_tile, act_k, preferred_element_type=jnp.float32)

    # Layer epilogue on the last contraction step: (A@act) @ W + b, ReLU.
    @pl.when(k == nk - 1)
    def _():
        y = jnp.dot(acc_ref[...].astype(w_ref.dtype), w_ref[...],
                    preferred_element_type=jnp.float32)
        y = jnp.maximum(y + b_ref[...], 0.0)          # f32 bias + ReLU epilogue

        @pl.when(l < num_layers - 1)                  # feed the next layer
        def _():
            row = pl.multiple_of(ws * n_pad + i * tm, tm)
            act_ref[pl.ds(row, tm), :] = y.astype(act_ref.dtype)

        @pl.when(l == num_layers - 1)                 # only final layer -> HBM
        def _():
            o_ref[...] = y.astype(o_ref.dtype)


@functools.partial(jax.jit,
                   static_argnames=("tm_req", "tk_req", "compute_dtype",
                                    "force_stream"))
def gcn_forward(A, x, params, *, tm_req=256, tk_req=512,
                compute_dtype=jnp.bfloat16, force_stream=False):
    """Full GCN forward (all GraphConv layers) in a single pallas_call."""
    n = A.shape[0]
    dims = [x.shape[1]] + [w.shape[1] for w, _ in params]
    num_layers = len(params)

    d_pad = _round_up(max(dims), 128)           # lane-dense feature width
    esz = jnp.dtype(compute_dtype).itemsize

    _, budget = _vmem_budget()
    plan = _plan(n, d_pad, esz, tm_req, tk_req, budget, force_stream)
    tm, tk, n_pad = plan["tm"], plan["tk"], plan["n_pad"]
    resident_a = plan["resident"]

    cdt = compute_dtype
    a_pad = jnp.zeros((n_pad, n_pad), cdt).at[:n, :n].set(A.astype(cdt))
    x_pad = jnp.zeros((n_pad, d_pad), cdt).at[:n, :dims[0]].set(x.astype(cdt))
    w_stack = jnp.zeros((num_layers, d_pad, d_pad), cdt)
    b_stack = jnp.zeros((num_layers, 1, d_pad), jnp.float32)
    for li, (w, b) in enumerate(params):
        di, do = w.shape
        w_stack = w_stack.at[li, :di, :do].set(w.astype(cdt))
        b_stack = b_stack.at[li, 0, :do].set(b.astype(jnp.float32))

    grid = (num_layers, n_pad // tm, n_pad // tk)

    a_spec = (pl.BlockSpec(memory_space=pl.ANY) if resident_a
              else _streamed_a_spec(tm, tk))
    in_specs = [
        a_spec,                                                          # A
        pl.BlockSpec(memory_space=pl.ANY),                               # x (HBM)
        pl.BlockSpec((None, d_pad, d_pad), lambda l, i, k: (l, 0, 0)),   # W_l
        pl.BlockSpec((None, 1, d_pad), lambda l, i, k: (l, 0, 0)),       # b_l
    ]
    scratch = [
        pltpu.VMEM((tm, d_pad), jnp.float32),        # A@act f32 accumulator
        pltpu.VMEM((2 * n_pad, d_pad), cdt),         # activation ping-pong
    ]
    if resident_a:
        scratch.append(pltpu.VMEM((n_pad, n_pad), cdt))   # resident A (1 copy)
    scratch.append(pltpu.SemaphoreType.DMA((2,)))

    kernel = functools.partial(_gcn_kernel, tm=tm, tk=tk, n_pad=n_pad,
                               num_layers=num_layers, resident_a=resident_a)

    out = pl.pallas_call(
        kernel,
        out_shape=jax.ShapeDtypeStruct((n_pad, d_pad), jnp.float32),
        grid_spec=pltpu.PrefetchScalarGridSpec(
            num_scalar_prefetch=0,
            grid=grid,
            in_specs=in_specs,
            out_specs=pl.BlockSpec((tm, d_pad), lambda l, i, k: (i, 0)),
            scratch_shapes=scratch,
        ),
        compiler_params=pltpu.CompilerParams(
            # Every axis carries a dependency through the resident scratch
            # buffers, so none can be marked "parallel" in this fused design.
            dimension_semantics=("arbitrary", "arbitrary", "arbitrary"),
            vmem_limit_bytes=int(budget),
        ),
    )(a_pad, x_pad, w_stack, b_stack)

    return out[:n, :dims[-1]]


def init_gcn_params(key, layers):
    """Params mirroring GraphConv.__init__: W ~ randn(in, out), b ~ randn(out)."""
    params = []
    for i in range(1, len(layers)):
        key, kw, kb = jax.random.split(key, 3)
        params.append((
            jax.random.normal(kw, (layers[i - 1], layers[i]), dtype=jnp.float32),
            jax.random.normal(kb, (layers[i],), dtype=jnp.float32),
        ))
    return params


def gcn_reference(A, x, params):
    """Pure-JAX reference with full-precision matmuls (PyTorch semantics)."""
    hi = jax.lax.Precision.HIGHEST
    y = x
    for w, b in params:
        y = jnp.maximum(jnp.dot(jnp.dot(A, y, precision=hi), w, precision=hi) + b, 0.0)
    return y


def _max_rel_err(y, ref):
    return float(jnp.max(jnp.abs(y - ref)) / jnp.maximum(jnp.max(jnp.abs(ref)), 1.0))


if __name__ == "__main__":
    key = jax.random.PRNGKey(0)

    # --- 1) module-sized graph: 8 nodes, dims 4 -> 32 -> 16, f32, resident A -
    num_nodes, layer_dims = 8, [4, 32, 16]
    key, ka, kx, kp = jax.random.split(key, 4)
    A = jax.random.normal(ka, (num_nodes, num_nodes), dtype=jnp.float32)
    x = jax.random.normal(kx, (num_nodes, layer_dims[0]), dtype=jnp.float32)
    params = init_gcn_params(kp, layer_dims)

    y = gcn_forward(A, x, params, compute_dtype=jnp.float32)
    jax.block_until_ready(y)
    ref = gcn_reference(A, x, params)
    assert y.shape == (num_nodes, layer_dims[-1])
    err = _max_rel_err(y, ref)
    assert err < 1e-4, f"f32 small-graph error too large: {err}"

    # --- 2) larger graph, f32, resident A -----------------------------------
    n2, layer_dims2 = 256, [12, 40, 24]
    key, ka2, kx2, kp2 = jax.random.split(key, 4)
    A2 = jax.random.normal(ka2, (n2, n2), dtype=jnp.float32)
    x2 = jax.random.normal(kx2, (n2, layer_dims2[0]), dtype=jnp.float32)
    params2 = init_gcn_params(kp2, layer_dims2)
    ref2 = gcn_reference(A2, x2, params2)

    y2 = gcn_forward(A2, x2, params2, compute_dtype=jnp.float32)
    jax.block_until_ready(y2)
    err2 = _max_rel_err(y2, ref2)
    assert err2 < 1e-4, f"f32 resident-A error too large: {err2}"

    # --- 3) streamed-A fallback path (row + contraction tiled grid) ---------
    y3 = gcn_forward(A2, x2, params2, tm_req=128, tk_req=128,
                     compute_dtype=jnp.float32, force_stream=True)
    jax.block_until_ready(y3)
    err3 = _max_rel_err(y3, ref2)
    assert err3 < 1e-4, f"f32 streamed-A error too large: {err3}"

    # --- 4) default bf16 MXU path (f32 accumulation / epilogue) -------------
    y4 = gcn_forward(A2, x2, params2)
    jax.block_until_ready(y4)
    err4 = _max_rel_err(y4, ref2)
    assert err4 < 1e-1, f"bf16 error too large: {err4}"

    print("KERNEL_OK")
</pallas_src>

<mosaic_0001>
module attributes {stable_mosaic.version = 11 : i64} {
  func.func @_gcn_kernel(%arg0: i32, %arg1: i32, %arg2: i32, %arg3: memref<128x128xf32, #tpu.memory_space<any>>, %arg4: memref<128x128xf32, #tpu.memory_space<any>>, %arg5: memref<1x128x128xf32, #tpu.memory_space<vmem>>, %arg6: memref<1x1x128xf32, #tpu.memory_space<vmem>>, %arg7: memref<128x128xf32, #tpu.memory_space<vmem>>, %arg8: memref<128x128xf32, #tpu.memory_space<vmem>>, %arg9: memref<256x128xf32, #tpu.memory_space<vmem>>, %arg10: memref<128x128xf32, #tpu.memory_space<vmem>>, %arg11: memref<2x!tpu.dma_semaphore, #tpu.memory_space<semaphore_mem>>) attributes {dimension_semantics = [#tpu.dimension_semantics<arbitrary>, #tpu.dimension_semantics<arbitrary>, #tpu.dimension_semantics<arbitrary>], iteration_bounds = array<i64: 2, 1, 1>, scalar_prefetch = 0 : i64, scratch_operands = 4 : i64, tpu.core_type = #tpu.core_type<tc>, window_params = [{}, {}, {transform_indices = @transform_2, window_bounds = array<i64: 1, 128, 128>}, {transform_indices = @transform_3, window_bounds = array<i64: 1, 1, 128>}, {transform_indices = @transform_4, window_bounds = array<i64: 128, 128>}]} {
    %c0_i32 = arith.constant 0 : i32
    %0 = arith.cmpi eq, %arg0, %c0_i32 : i32
    %c0_i32_0 = arith.constant 0 : i32
    %1 = arith.cmpi eq, %arg1, %c0_i32_0 : i32
    %2 = arith.andi %0, %1 : i1
    %c0_i32_1 = arith.constant 0 : i32
    %3 = arith.cmpi eq, %arg2, %c0_i32_1 : i32
    %4 = arith.andi %2, %3 : i1
    %5 = arith.extui %4 : i1 to i32
    %c0_i32_2 = arith.constant 0 : i32
    %6 = arith.cmpi ne, %5, %c0_i32_2 : i32
    scf.if %6 {
      %c0_i32_16 = arith.constant 0 : i32
      %c0_i32_17 = arith.constant 0 : i32
      %c0_i32_18 = arith.constant 0 : i32
      %30 = tpu.memref_slice %arg9[%c0_i32_17, %c0_i32_18] : memref<256x128xf32, #tpu.memory_space<vmem>> -> memref<128x128xf32, #tpu.memory_space<vmem>>
      %31 = tpu.memref_slice %arg11[%c0_i32_16] : memref<2x!tpu.dma_semaphore, #tpu.memory_space<semaphore_mem>> -> memref<1x!tpu.dma_semaphore, #tpu.memory_space<semaphore_mem>>
      %32 = tpu.memref_squeeze %31 : memref<1x!tpu.dma_semaphore, #tpu.memory_space<semaphore_mem>> -> memref<!tpu.dma_semaphore, #tpu.memory_space<semaphore_mem>>
      tpu.enqueue_dma source(%arg4 : memref<128x128xf32, #tpu.memory_space<any>>) target(%30 : memref<128x128xf32, #tpu.memory_space<vmem>>) target_semaphore(%32 : memref<!tpu.dma_semaphore, #tpu.memory_space<semaphore_mem>>)
      %c1_i32_19 = arith.constant 1 : i32
      %33 = tpu.memref_slice %arg11[%c1_i32_19] : memref<2x!tpu.dma_semaphore, #tpu.memory_space<semaphore_mem>> -> memref<1x!tpu.dma_semaphore, #tpu.memory_space<semaphore_mem>>
      %34 = tpu.memref_squeeze %33 : memref<1x!tpu.dma_semaphore, #tpu.memory_space<semaphore_mem>> -> memref<!tpu.dma_semaphore, #tpu.memory_space<semaphore_mem>>
      tpu.enqueue_dma source(%arg3 : memref<128x128xf32, #tpu.memory_space<any>>) target(%arg10 : memref<128x128xf32, #tpu.memory_space<vmem>>) target_semaphore(%34 : memref<!tpu.dma_semaphore, #tpu.memory_space<semaphore_mem>>)
      %c1_i32_20 = arith.constant 1 : i32
      %35 = tpu.memref_slice %arg11[%c1_i32_20] : memref<2x!tpu.dma_semaphore, #tpu.memory_space<semaphore_mem>> -> memref<1x!tpu.dma_semaphore, #tpu.memory_space<semaphore_mem>>
      %36 = tpu.memref_squeeze %35 : memref<1x!tpu.dma_semaphore, #tpu.memory_space<semaphore_mem>> -> memref<!tpu.dma_semaphore, #tpu.memory_space<semaphore_mem>>
      tpu.wait_dma2 semaphore(%36 : memref<!tpu.dma_semaphore, #tpu.memory_space<semaphore_mem>>) src(%arg3 : memref<128x128xf32, #tpu.memory_space<any>>) dst(%arg10 : memref<128x128xf32, #tpu.memory_space<vmem>>)
      %c0_i32_21 = arith.constant 0 : i32
      %c0_i32_22 = arith.constant 0 : i32
      %c0_i32_23 = arith.constant 0 : i32
      %37 = tpu.memref_slice %arg9[%c0_i32_22, %c0_i32_23] : memref<256x128xf32, #tpu.memory_space<vmem>> -> memref<128x128xf32, #tpu.memory_space<vmem>>
      %38 = tpu.memref_slice %arg11[%c0_i32_21] : memref<2x!tpu.dma_semaphore, #tpu.memory_space<semaphore_mem>> -> memref<1x!tpu.dma_semaphore, #tpu.memory_space<semaphore_mem>>
      %39 = tpu.memref_squeeze %38 : memref<1x!tpu.dma_semaphore, #tpu.memory_space<semaphore_mem>> -> memref<!tpu.dma_semaphore, #tpu.memory_space<semaphore_mem>>
      tpu.wait_dma2 semaphore(%39 : memref<!tpu.dma_semaphore, #tpu.memory_space<semaphore_mem>>) src(%arg4 : memref<128x128xf32, #tpu.memory_space<any>>) dst(%37 : memref<128x128xf32, #tpu.memory_space<vmem>>)
    } else {
    }
    %c1_i32 = arith.constant 1 : i32
    %7 = arith.andi %arg0, %c1_i32 : i32
    %c1_i32_3 = arith.constant 1 : i32
    %8 = arith.addi %arg0, %c1_i32_3 : i32
    %c1_i32_4 = arith.constant 1 : i32
    %9 = arith.andi %8, %c1_i32_4 : i32
    %c0_i32_5 = arith.constant 0 : i32
    %10 = arith.cmpi eq, %arg2, %c0_i32_5 : i32
    %11 = arith.extui %10 : i1 to i32
    %c0_i32_6 = arith.constant 0 : i32
    %12 = arith.cmpi ne, %11, %c0_i32_6 : i32
    scf.if %12 {
      %cst_16 = arith.constant 0.000000e+00 : f32
      %30 = vector.broadcast %cst_16 : f32 to vector<128x128xf32>
      %c0_17 = arith.constant 0 : index
      %c0_18 = arith.constant 0 : index
      %31 = vector.load %arg8[%c0_17, %c0_18] : memref<128x128xf32, #tpu.memory_space<vmem>>, vector<128x128xf32>
      tpu.vector_store %arg8[%c0_17, %c0_18], %30 {strides = array<i32>} : memref<128x128xf32, #tpu.memory_space<vmem>>, vector<128x128xf32>,
    } else {
    }
    %c128_i32 = arith.constant 128 : i32
    %13 = arith.muli %arg1, %c128_i32 : i32
    %14 = tpu.assume_multiple %13, 128 : i32
    %15 = arith.index_cast %14 : i32 to index
    %c0 = arith.constant 0 : index
    %16 = vector.load %arg10[%15, %c0] : memref<128x128xf32, #tpu.memory_space<vmem>>, vector<128x128xf32>
    %c128_i32_7 = arith.constant 128 : i32
    %17 = arith.muli %7, %c128_i32_7 : i32
    %c128_i32_8 = arith.constant 128 : i32
    %18 = arith.muli %arg2, %c128_i32_8 : i32
    %19 = arith.addi %17, %18 : i32
    %20 = tpu.assume_multiple %19, 128 : i32
    %21 = arith.index_cast %20 : i32 to index
    %c0_9 = arith.constant 0 : index
    %22 = vector.load %arg9[%21, %c0_9] : memref<256x128xf32, #tpu.memory_space<vmem>>, vector<128x128xf32>
    %c0_10 = arith.constant 0 : index
    %c0_11 = arith.constant 0 : index
    %23 = vector.load %arg8[%c0_10, %c0_11] : memref<128x128xf32, #tpu.memory_space<vmem>>, vector<128x128xf32>
    %cst = arith.constant dense<0.000000e+00> : vector<128x128xf32>
    %24 = tpu.matmul %16, %22, %cst {dimension_numbers = #tpu.dot_dimension_numbers<[1], [0], [0], [1], [0, 0, 1, 1], [], []>} : vector<128x128xf32>, vector<128x128xf32>, vector<128x128xf32> -> vector<128x128xf32>
    %25 = arith.addf %23, %24 : vector<128x128xf32>
    %c0_12 = arith.constant 0 : index
    %c0_13 = arith.constant 0 : index
    %26 = vector.load %arg8[%c0_12, %c0_13] : memref<128x128xf32, #tpu.memory_space<vmem>>, vector<128x128xf32>
    tpu.vector_store %arg8[%c0_12, %c0_13], %25 {strides = array<i32>} : memref<128x128xf32, #tpu.memory_space<vmem>>, vector<128x128xf32>,
    %c0_i32_14 = arith.constant 0 : i32
    %27 = arith.cmpi eq, %arg2, %c0_i32_14 : i32
    %28 = arith.extui %27 : i1 to i32
    %c0_i32_15 = arith.constant 0 : i32
    %29 = arith.cmpi ne, %28, %c0_i32_15 : i32
    scf.if %29 {
      %c0_16 = arith.constant 0 : index
      %c0_17 = arith.constant 0 : index
      %30 = vector.load %arg8[%c0_16, %c0_17] : memref<128x128xf32, #tpu.memory_space<vmem>>, vector<128x128xf32>
      %c0_18 = arith.constant 0 : index
      %c0_19 = arith.constant 0 : index
      %c0_20 = arith.constant 0 : index
      %31 = vector.load %arg5[%c0_18, %c0_19, %c0_20] : memref<1x128x128xf32, #tpu.memory_space<vmem>>, vector<1x128x128xf32>
      %32 = vector.shape_cast %31 : vector<1x128x128xf32> to vector<128x128xf32>
      %cst_21 = arith.constant dense<0.000000e+00> : vector<128x128xf32>
      %33 = tpu.matmul %30, %32, %cst_21 {dimension_numbers = #tpu.dot_dimension_numbers<[1], [0], [0], [1], [0, 0, 1, 1], [], []>} : vector<128x128xf32>, vector<128x128xf32>, vector<128x128xf32> -> vector<128x128xf32>
      %c0_22 = arith.constant 0 : index
      %c0_23 = arith.constant 0 : index
      %c0_24 = arith.constant 0 : index
      %34 = vector.load %arg6[%c0_22, %c0_23, %c0_24] : memref<1x1x128xf32, #tpu.memory_space<vmem>>, vector<1x1x128xf32>
      %35 = vector.shape_cast %34 : vector<1x1x128xf32> to vector<1x128xf32>
      %36 = vector.broadcast %35 : vector<1x128xf32> to vector<128x128xf32>
      %37 = arith.addf %33, %36 : vector<128x128xf32>
      %cst_25 = arith.constant 0.000000e+00 : f32
      %38 = vector.broadcast %cst_25 : f32 to vector<128x128xf32>
      %39 = arith.maximumf %37, %38 : vector<128x128xf32>
      %c1_i32_26 = arith.constant 1 : i32
      %40 = arith.cmpi slt, %arg0, %c1_i32_26 : i32
      %41 = arith.extui %40 : i1 to i32
      %c0_i32_27 = arith.constant 0 : i32
      %42 = arith.cmpi ne, %41, %c0_i32_27 : i32
      scf.if %42 {
        %c128_i32_30 = arith.constant 128 : i32
        %46 = arith.muli %9, %c128_i32_30 : i32
        %c128_i32_31 = arith.constant 128 : i32
        %47 = arith.muli %arg1, %c128_i32_31 : i32
        %48 = arith.addi %46, %47 : i32
        %49 = tpu.assume_multiple %48, 128 : i32
        %50 = arith.index_cast %49 : i32 to index
        %c0_32 = arith.constant 0 : index
        %51 = vector.load %arg9[%50, %c0_32] : memref<256x128xf32, #tpu.memory_space<vmem>>, vector<128x128xf32>
        tpu.vector_store %arg9[%50, %c0_32], %39 {strides = array<i32>} : memref<256x128xf32, #tpu.memory_space<vmem>>, vector<128x128xf32>,
      } else {
      }
      %c1_i32_28 = arith.constant 1 : i32
      %43 = arith.cmpi eq, %arg0, %c1_i32_28 : i32
      %44 = arith.extui %43 : i1 to i32
      %c0_i32_29 = arith.constant 0 : i32
      %45 = arith.cmpi ne, %44, %c0_i32_29 : i32
      scf.if %45 {
        %c0_30 = arith.constant 0 : index
        %c0_31 = arith.constant 0 : index
        %46 = vector.load %arg7[%c0_30, %c0_31] : memref<128x128xf32, #tpu.memory_space<vmem>>, vector<128x128xf32>
        tpu.vector_store %arg7[%c0_30, %c0_31], %39 {strides = array<i32>} : memref<128x128xf32, #tpu.memory_space<vmem>>, vector<128x128xf32>,
      } else {
      }
    } else {
    }
    return
  }
  func.func @transform_2(%arg0: i32, %arg1: i32, %arg2: i32) -> (i32, i32, i32) {
    %c0_i32 = arith.constant 0 : i32
    %c0_i32_0 = arith.constant 0 : i32
    %c0_i32_1 = arith.constant 0 : i32
    return %arg0, %c0_i32, %c0_i32_0 : i32, i32, i32
  }
  func.func @transform_3(%arg0: i32, %arg1: i32, %arg2: i32) -> (i32, i32, i32) {
    %c0_i32 = arith.constant 0 : i32
    %c0_i32_0 = arith.constant 0 : i32
    %c0_i32_1 = arith.constant 0 : i32
    return %arg0, %c0_i32, %c0_i32_0 : i32, i32, i32
  }
  func.func @transform_4(%arg0: i32, %arg1: i32, %arg2: i32) -> (i32, i32) {
    %c0_i32 = arith.constant 0 : i32
    %c0_i32_0 = arith.constant 0 : i32
    return %arg1, %c0_i32 : i32, i32
  }
}

</mosaic_0001>

<bundles_post_ra>
// kernel: gcn_forward.1
= control target key start
LH: loop header
LB: loop body
LE: loop exit
PB: predicated region body
PF: predicated region fallthrough
CT: control target
= control target key end

     0   :  { %s863_s15 = smov 0   ;;  %s865_s16 = smov 0   ;;  %s1128_s0 = inlined_call_operand.vmem [shape: f32[128,128], index: 0, kind: input, shape index: {}]   ;;  %s1129_s1 = inlined_call_operand.vmem [shape: f32[128,128], index: 1, kind: input, shape index: {}]   ;;  %s1130_s2 = inlined_call_operand.vmem [shape: f32[2,128,128], index: 2, kind: input, shape index: {}]   ;;  %s1131_s3 = inlined_call_operand.vmem [shape: f32[2,1,128], index: 3, kind: input, shape index: {}]   ;;  %s1132_s4 = inlined_call_operand.vmem [shape: f32[128,128], index: 4, kind: output, shape index: {}]  }
   0x1   :  { %s867_s17 = smov 0  }
   0x2 LB: > { %s33_s18 = sadd.s32 1, %s832_s16  ;;  %p735_p0 = scmp.ge.s32.totalorder %s836_s17, 1  ;;  %s836_s17 = sphi %s867_s17, %s14_s17   ;;  %s832_s16 = sphi %s865_s16, %s1134_s16   ;;  %s828_s15 = sphi %s863_s15, %s1133_s15  }
   0x3   : > { %p35_p1 = scmp.ge.s32.totalorder %s33_s18, 2  ;;  %p141_p2 = scmp.lt.s32.totalorder %s836_s17, 3 }
   0x5   : > { %s1136_s18 = smov (%p35_p1, %s33_s18), 0  ;;  %p142_p3 = pnand %p735_p0, %p141_p2 }
   0x6   : > { %p166_p4 = scmp.lt.s32.totalorder (!%p142_p3), %s828_s15, 1  ;;  %p180_p5 = scmp.eq.s32.totalorder (!%p142_p3), %s828_s15, 0 }
   0x7   : > { %145 = sbr.rel (%p142_p3) target bundleno = 452 (0x1c4), region = 28 }
   0xc   : > { %s886_s19 = scalar_select %p166_p4, %s828_s15, 1  ;;  %v199_v0 = vld [vmem:[%s1129_s1] sm:$0xff] (%p180_p5)  ;;  %v201_v1 = vld [vmem:[%s1129_s1 + $0x8] sm:$0xff] (%p180_p5)  ;;  %v203_v2 = vld [vmem:[%s1129_s1 + $0x10] sm:$0xff] (%p180_p5) }
   0xd   : > { %188 = sbr.rel (!%p180_p5) target bundleno = 51 (0x33), region = 32  ;;  %200 = vst [vmem:[#allocation3] sm:$0xff] (%p180_p5), %v199_v0  ;;  %v205_v3 = vld [vmem:[%s1129_s1 + $0x18] sm:$0xff] (%p180_p5)  ;;  %v207_v4 = vld [vmem:[%s1129_s1 + $0x20] sm:$0xff] (%p180_p5)  ;;  %v209_v5 = vld [vmem:[%s1129_s1 + $0x28] sm:$0xff] (%p180_p5) }
   0xe   : > { %s750_s20 = sshll.u32 %s886_s19, 7  ;;  %s173_s23 = scalar_lea.vmem %s1131_s3, %s886_s19  ;;  %202 = vst [vmem:[#allocation3 + $0x8] sm:$0xff] (%p180_p5), %v201_v1  ;;  %v211_v6 = vld [vmem:[%s1129_s1 + $0x30] sm:$0xff] (%p180_p5)  ;;  %v213_v7 = vld [vmem:[%s1129_s1 + $0x38] sm:$0xff] (%p180_p5)  ;;  %v215_v8 = vld [vmem:[%s1129_s1 + $0x40] sm:$0xff] (%p180_p5) }
   0xf   : > { %s896_s26 = scalar_lea.vmem %s1130_s2, %s750_s20  ;;  %204 = vst [vmem:[#allocation3 + $0x10] sm:$0xff] (%p180_p5), %v203_v2  ;;  %v217_v9 = vld [vmem:[%s1129_s1 + $0x48] sm:$0xff] (%p180_p5)  ;;  %v219_v10 = vld [vmem:[%s1129_s1 + $0x50] sm:$0xff] (%p180_p5)  ;;  %v221_v11 = vld [vmem:[%s1129_s1 + $0x58] sm:$0xff] (%p180_p5) }
  0x10   : > { %206 = vst [vmem:[#allocation3 + $0x18] sm:$0xff] (%p180_p5), %v205_v3  ;;  %v223_v12 = vld [vmem:[%s1129_s1 + $0x60] sm:$0xff] (%p180_p5)  ;;  %v225_v13 = vld [vmem:[%s1129_s1 + $0x68] sm:$0xff] (%p180_p5)  ;;  %v227_v14 = vld [vmem:[%s1129_s1 + $0x70] sm:$0xff] (%p180_p5) }
  0x11   : > { %208 = vst [vmem:[#allocation3 + $0x20] sm:$0xff] (%p180_p5), %v207_v4  ;;  %v229_v15 = vld [vmem:[%s1129_s1 + $0x78] sm:$0xff] (%p180_p5) }
  0x12   : > { %210 = vst [vmem:[#allocation3 + $0x28] sm:$0xff] %v209_v5 }
  0x13   : > { %212 = vst [vmem:[#allocation3 + $0x30] sm:$0xff] %v211_v6 }
  0x14   : > { %214 = vst [vmem:[#allocation3 + $0x38] sm:$0xff] %v213_v7 }
  0x15   : > { %216 = vst [vmem:[#allocation3 + $0x40] sm:$0xff] %v215_v8 }
  0x16   : > { %218 = vst [vmem:[#allocation3 + $0x48] sm:$0xff] %v217_v9 }
  0x17   : > { %220 = vst [vmem:[#allocation3 + $0x50] sm:$0xff] %v219_v10 }
  0x18   : > { %222 = vst [vmem:[#allocation3 + $0x58] sm:$0xff] %v221_v11 }
  0x19   : > { %224 = vst [vmem:[#allocation3 + $0x60] sm:$0xff] %v223_v12 }
  0x1a   : > { %226 = vst [vmem:[#allocation3 + $0x68] sm:$0xff] %v225_v13 }
  0x1b   : > { %228 = vst [vmem:[#allocation3 + $0x70] sm:$0xff] %v227_v14 }
  0x1c   : > { %230 = vst [vmem:[#allocation3 + $0x78] sm:$0xff] %v229_v15 }
  0x1d   : > { %236 = vsyncadd [#allocation5], 2048  ;;  %v248_v16 = vld [vmem:[%s1128_s0] sm:$0xff]  ;;  %v250_v17 = vld [vmem:[%s1128_s0 + $0x8] sm:$0xff] }
  0x1e   : > { %249 = vst [vmem:[#allocation4 + $0x30] sm:$0xff] %v248_v16  ;;  %v252_v18 = vld [vmem:[%s1128_s0 + $0x10] sm:$0xff]  ;;  %v254_v19 = vld [vmem:[%s1128_s0 + $0x18] sm:$0xff]  ;;  %v256_v20 = vld [vmem:[%s1128_s0 + $0x20] sm:$0xff] }
  0x1f   : > { %251 = vst [vmem:[#allocation4] sm:$0xff] %v250_v17  ;;  %v258_v21 = vld [vmem:[%s1128_s0 + $0x28] sm:$0xff]  ;;  %v260_v22 = vld [vmem:[%s1128_s0 + $0x30] sm:$0xff]  ;;  %v262_v23 = vld [vmem:[%s1128_s0 + $0x38] sm:$0xff] }
  0x20   : > { %253 = vst [vmem:[#allocation4 + $0x58] sm:$0xff] %v252_v18  ;;  %v264_v24 = vld [vmem:[%s1128_s0 + $0x40] sm:$0xff]  ;;  %v266_v25 = vld [vmem:[%s1128_s0 + $0x48] sm:$0xff]  ;;  %v268_v26 = vld [vmem:[%s1128_s0 + $0x50] sm:$0xff] }
  0x21   : > { %255 = vst [vmem:[#allocation4 + $0x18] sm:$0xff] %v254_v19  ;;  %v270_v27 = vld [vmem:[%s1128_s0 + $0x58] sm:$0xff]  ;;  %v272_v28 = vld [vmem:[%s1128_s0 + $0x60] sm:$0xff]  ;;  %v274_v29 = vld [vmem:[%s1128_s0 + $0x68] sm:$0xff] }
  0x22   : > { %257 = vst [vmem:[#allocation4 + $0x50] sm:$0xff] %v256_v20  ;;  %v276_v30 = vld [vmem:[%s1128_s0 + $0x70] sm:$0xff]  ;;  %v278_v31 = vld [vmem:[%s1128_s0 + $0x78] sm:$0xff] }
  0x23   : > { %259 = vst [vmem:[#allocation4 + $0x68] sm:$0xff] %v258_v21 }
  0x24   : > { %261 = vst [vmem:[#allocation4 + $0x8] sm:$0xff] %v260_v22 }
  0x25   : > { %263 = vst [vmem:[#allocation4 + $0x48] sm:$0xff] %v262_v23 }
  0x26   : > { %265 = vst [vmem:[#allocation4 + $0x40] sm:$0xff] %v264_v24 }
  0x27   : > { %267 = vst [vmem:[#allocation4 + $0x20] sm:$0xff] %v266_v25 }
  0x28   : > { %269 = vst [vmem:[#allocation4 + $0x10] sm:$0xff] %v268_v26 }
  0x29   : > { %271 = vst [vmem:[#allocation4 + $0x38] sm:$0xff] %v270_v27 }
  0x2a   : > { %273 = vst [vmem:[#allocation4 + $0x60] sm:$0xff] %v272_v28 }
  0x2b   : > { %275 = vst [vmem:[#allocation4 + $0x70] sm:$0xff] %v274_v29 }
  0x2c   : > { %277 = vst [vmem:[#allocation4 + $0x78] sm:$0xff] %v276_v30 }
  0x2d   : > { %279 = vst [vmem:[#allocation4 + $0x28] sm:$0xff] %v278_v31 }
  0x2e   : > { %285 = vsyncadd [#allocation5 + $0x1], 2048 }
  0x2f   : > { %822 = dma.done.wait [#allocation5 + $0x1], 2048 }
  0x30   : > { %823 = vsyncadd [#allocation5 + $0x1], 4294965248 }
  0x31   : > { %824 = dma.done.wait [#allocation5], 2048 }
  0x32   : > { %825 = vsyncadd [#allocation5], 4294965248 }
  0x33 PF: > { %s291_s8 = sand.u32 1, %s828_s15  ;;  %s292_s9 = sadd.s32 1, %s828_s15  ;;  %v323_v48 = vld [vmem:[#allocation4 + $0x40] sm:$0xff]  ;;  %v315_v49 = vld [vmem:[#allocation4 + $0x30] sm:$0xff]  ;;  %v317_v53 = vld [vmem:[#allocation4 + $0x58] sm:$0xff] }
  0x34   : > { %s740_s10 = sshll.u32 %s291_s8, 7  ;;  %s996_s11 = sand.u32 1, %s292_s9  ;;  %v324_v50 = vld [vmem:[#allocation4 + $0x20] sm:$0xff]  ;;  %v325_v52 = vld [vmem:[#allocation4 + $0x10] sm:$0xff]  ;;  %v326_v54 = vld [vmem:[#allocation4 + $0x38] sm:$0xff] }
  0x35   : > { %s998_s12 = scalar_lea.vmem [#allocation3], %s740_s10  ;;  %v316_v51 = vld [vmem:[#allocation4] sm:$0xff]  ;;  %v318_v55 = vld [vmem:[#allocation4 + $0x18] sm:$0xff]  ;;  %v497_v57 = vld [vmem:[%s896_s26 + $0x70] sm:$0xff]  ;;  %p741_p6 = scmp.ge.s32.totalorder %s828_s15, 1 }
  0x36   : > { %v498_v56 = vld [vmem:[%s896_s26 + $0x78] sm:$0xff]  ;;  %v496_v58 = vld [vmem:[%s896_s26 + $0x68] sm:$0xff]  ;;  %v495_v59 = vld [vmem:[%s896_s26 + $0x60] sm:$0xff]  ;;  %s742_s19 = sshll.u32 (!%p741_p6), %s996_s11, 7 }
  0x37   : > { %769 = vmatpush.msra.mxu3 %v498_v56  ;;  %503 = vmatpush.msra.mxu1 %v498_v56  ;;  %v327_v60 = vld [vmem:[#allocation4 + $0x60] sm:$0xff]  ;;  %v319_v61 = vld [vmem:[#allocation4 + $0x50] sm:$0xff]  ;;  %v494_v62 = vld [vmem:[%s896_s26 + $0x58] sm:$0xff] }
  0x38   : > { %v493_v63 = vld [vmem:[%s896_s26 + $0x50] sm:$0xff]  ;;  %v492_v0 = vld [vmem:[%s896_s26 + $0x48] sm:$0xff]  ;;  %v491_v1 = vld [vmem:[%s896_s26 + $0x40] sm:$0xff] }
  0x39   : > { %770 = vmatpush.msra.mxu3 %v497_v57  ;;  %504 = vmatpush.msra.mxu1 %v497_v57  ;;  %v328_v2 = vld [vmem:[#allocation4 + $0x70] sm:$0xff]  ;;  %v320_v3 = vld [vmem:[#allocation4 + $0x68] sm:$0xff]  ;;  %v490_v4 = vld [vmem:[%s896_s26 + $0x38] sm:$0xff] }
  0x3a   : > { %v350_v32 = vld [vmem:[%s998_s12 + $0x78] sm:$0xff]  ;;  %v349_v33 = vld [vmem:[%s998_s12 + $0x70] sm:$0xff]  ;;  %v348_v34 = vld [vmem:[%s998_s12 + $0x68] sm:$0xff] }
  0x3b   : > { %753 = vmatpush.msra.mxu2 %v350_v32  ;;  %367 = vmatpush.msra.mxu0 %v350_v32  ;;  %v347_v35 = vld [vmem:[%s998_s12 + $0x60] sm:$0xff]  ;;  %v346_v36 = vld [vmem:[%s998_s12 + $0x58] sm:$0xff]  ;;  %v345_v37 = vld [vmem:[%s998_s12 + $0x50] sm:$0xff] }
  0x3c   : > { %v344_v38 = vld [vmem:[%s998_s12 + $0x48] sm:$0xff]  ;;  %v343_v39 = vld [vmem:[%s998_s12 + $0x40] sm:$0xff]  ;;  %v342_v40 = vld [vmem:[%s998_s12 + $0x38] sm:$0xff]  ;;  %771 = vmatpush.msra.mxu3 %v496_v58  ;;  %505 = vmatpush.msra.mxu1 %v496_v58 }
  0x3d   : > { %754 = vmatpush.msra.mxu2 %v349_v33  ;;  %368 = vmatpush.msra.mxu0 %v349_v33  ;;  %v341_v41 = vld [vmem:[%s998_s12 + $0x30] sm:$0xff]  ;;  %v340_v42 = vld [vmem:[%s998_s12 + $0x28] sm:$0xff]  ;;  %v339_v43 = vld [vmem:[%s998_s12 + $0x20] sm:$0xff] }
  0x3e   : > { %v338_v44 = vld [vmem:[%s998_s12 + $0x18] sm:$0xff]  ;;  %v337_v45 = vld [vmem:[%s998_s12 + $0x10] sm:$0xff]  ;;  %v336_v46 = vld [vmem:[%s998_s12 + $0x8] sm:$0xff]  ;;  %772 = vmatpush.msra.mxu3 %v495_v59  ;;  %506 = vmatpush.msra.mxu1 %v495_v59 }
  0x3f   : > { %755 = vmatpush.msra.mxu2 %v348_v34  ;;  %369 = vmatpush.msra.mxu0 %v348_v34  ;;  %v335_v47 = vld [vmem:[%s998_s12] sm:$0xff]  ;;  %v489_v5 = vld [vmem:[%s896_s26 + $0x30] sm:$0xff]  ;;  %v488_v6 = vld [vmem:[%s896_s26 + $0x28] sm:$0xff] }
  0x40   : > { %773 = vmatpush.msra.mxu3 %v494_v62  ;;  %507 = vmatpush.msra.mxu1 %v494_v62  ;;  %v487_v7 = vld [vmem:[%s896_s26 + $0x20] sm:$0xff]  ;;  %v329_v8 = vld [vmem:[#allocation4 + $0x78] sm:$0xff]  ;;  %v321_v9 = vld [vmem:[#allocation4 + $0x8] sm:$0xff] }
  0x41   : > { %756 = vmatpush.msra.mxu2 %v347_v35  ;;  %370 = vmatpush.msra.mxu0 %v347_v35  ;;  %v486_v10 = vld [vmem:[%s896_s26 + $0x18] sm:$0xff]  ;;  %v485_v11 = vld [vmem:[%s896_s26 + $0x10] sm:$0xff]  ;;  %v484_v12 = vld [vmem:[%s896_s26 + $0x8] sm:$0xff] }
  0x42   : > { %774 = vmatpush.msra.mxu3 %v493_v63  ;;  %508 = vmatpush.msra.mxu1 %v493_v63  ;;  %v330_v13 = vld [vmem:[#allocation4 + $0x28] sm:$0xff]  ;;  %v483_v15 = vld [vmem:[%s896_s26] sm:$0xff] }
  0x43   : > { %757 = vmatpush.msra.mxu2 %v346_v36  ;;  %371 = vmatpush.msra.mxu0 %v346_v36  ;;  %v322_v14 = vld [vmem:[#allocation4 + $0x48] sm:$0xff]  ;;  %v809_v32 = vld [vmem:[%s173_s23] ss:$0 sm:$0xff]  ;;  %s590_s23 = scalar_lea.vmem (!%p741_p6), [#allocation3], %s742_s19 }
  0x44   : > { %775 = vmatpush.msra.mxu3 %v492_v0  ;;  %509 = vmatpush.msra.mxu1 %v492_v0 }
  0x45   : > { %758 = vmatpush.msra.mxu2 %v345_v37  ;;  %372 = vmatpush.msra.mxu0 %v345_v37 }
  0x46   : > { %776 = vmatpush.msra.mxu3 %v491_v1  ;;  %510 = vmatpush.msra.mxu1 %v491_v1 }
  0x47   : > { %759 = vmatpush.msra.mxu2 %v344_v38  ;;  %373 = vmatpush.msra.mxu0 %v344_v38 }
  0x48   : > { %777 = vmatpush.msra.mxu3 %v490_v4  ;;  %511 = vmatpush.msra.mxu1 %v490_v4 }
  0x49   : > { %760 = vmatpush.msra.mxu2 %v343_v39  ;;  %374 = vmatpush.msra.mxu0 %v343_v39 }
  0x4a   : > { %778 = vmatpush.msra.mxu3 %v489_v5  ;;  %512 = vmatpush.msra.mxu1 %v489_v5 }
  0x4b   : > { %761 = vmatpush.msra.mxu2 %v342_v40  ;;  %375 = vmatpush.msra.mxu0 %v342_v40 }
  0x4c   : > { %779 = vmatpush.msra.mxu3 %v488_v6  ;;  %513 = vmatpush.msra.mxu1 %v488_v6 }
  0x4d   : > { %762 = vmatpush.msra.mxu2 %v341_v41  ;;  %376 = vmatpush.msra.mxu0 %v341_v41 }
  0x4e   : > { %780 = vmatpush.msra.mxu3 %v487_v7  ;;  %514 = vmatpush.msra.mxu1 %v487_v7 }
  0x4f   : > { %763 = vmatpush.msra.mxu2 %v340_v42  ;;  %377 = vmatpush.msra.mxu0 %v340_v42 }
  0x50   : > { %781 = vmatpush.msra.mxu3 %v486_v10  ;;  %515 = vmatpush.msra.mxu1 %v486_v10 }
  0x51   : > { %764 = vmatpush.msra.mxu2 %v339_v43  ;;  %378 = vmatpush.msra.mxu0 %v339_v43 }
  0x52   : > { %782 = vmatpush.msra.mxu3 %v485_v11  ;;  %516 = vmatpush.msra.mxu1 %v485_v11 }
  0x53   : > { %765 = vmatpush.msra.mxu2 %v338_v44  ;;  %379 = vmatpush.msra.mxu0 %v338_v44 }
  0x54   : > { %783 = vmatpush.msra.mxu3 %v484_v12  ;;  %517 = vmatpush.msra.mxu1 %v484_v12 }
  0x55   : > { %766 = vmatpush.msra.mxu2 %v337_v45  ;;  %380 = vmatpush.msra.mxu0 %v337_v45 }
  0x56   : > { %784 = vmatpush.msra.mxu3 %v483_v15  ;;  %518 = vmatpush.msra.mxu1 %v483_v15 }
  0x57   : > { %767 = vmatpush.msra.mxu2 %v336_v46  ;;  %381 = vmatpush.msra.mxu0 %v336_v46 }
  0x59   : > { %768 = vmatpush.msra.mxu2 %v335_v47  ;;  %382 = vmatpush.msra.mxu0 %v335_v47 }
  0x5a   : > { %407 = vmatmul.f32.vlgmr.msra.gmra.mxu2 %v323_v48  ;;  %383 = vmatmul.f32.vlgmr.msra.gmra.mxu0 %v315_v49 }
  0x62   : > { %410 = vmatmul.f32.gmra.mxu2 %v324_v50  ;;  %386 = vmatmul.f32.gmra.mxu0 %v316_v51 }
  0x6a   : > { %413 = vmatmul.f32.gmra.mxu2 %v325_v52  ;;  %389 = vmatmul.f32.gmra.mxu0 %v317_v53 }
  0x72   : > { %416 = vmatmul.f32.gmra.mxu2 %v326_v54  ;;  %392 = vmatmul.f32.gmra.mxu0 %v318_v55 }
  0x7a   : > { %419 = vmatmul.f32.gmra.mxu2 %v327_v60  ;;  %395 = vmatmul.f32.gmra.mxu0 %v319_v61 }
  0x82   : > { %422 = vmatmul.f32.gmra.mxu2 %v328_v2  ;;  %398 = vmatmul.f32.gmra.mxu0 %v320_v3 }
  0x8a   : > { %425 = vmatmul.f32.gmra.mxu2 %v329_v8  ;;  %401 = vmatmul.f32.gmra.mxu0 %v321_v9 }
  0x92   : > { %428 = vmatmul.f32.gmra.mxu2 %v330_v13  ;;  %404 = vmatmul.f32.gmra.mxu0 %v322_v14 }
  0xd7   : > { %v384_v16 = vpop.f32.mrf.mxu0 }
  0xd8   : > { %519 = vmatmul.f32.vlgmr.msra.gmra.mxu1 %v384_v16 }
  0xdd   : > { %v408_v17 = vpop.f32.mrf.mxu2 }
  0xde   : > { %543 = vmatmul.f32.vlgmr.msra.gmra.mxu3 %v408_v17 }
  0xdf   : > { %v387_v18 = vpop.f32.mrf.mxu0 }
  0xe0   : > { %522 = vmatmul.f32.gmra.mxu1 %v387_v18 }
  0xe5   : > { %v411_v19 = vpop.f32.mrf.mxu2 }
  0xe6   : > { %546 = vmatmul.f32.gmra.mxu3 %v411_v19 }
  0xe7   : > { %v390_v20 = vpop.f32.mrf.mxu0 }
  0xe8   : > { %525 = vmatmul.f32.gmra.mxu1 %v390_v20 }
  0xed   : > { %v414_v21 = vpop.f32.mrf.mxu2 }
  0xee   : > { %549 = vmatmul.f32.gmra.mxu3 %v414_v21 }
  0xef   : > { %v393_v22 = vpop.f32.mrf.mxu0 }
  0xf0   : > { %528 = vmatmul.f32.gmra.mxu1 %v393_v22 }
  0xf5   : > { %v417_v23 = vpop.f32.mrf.mxu2 }
  0xf6   : > { %552 = vmatmul.f32.gmra.mxu3 %v417_v23 }
  0xf7   : > { %v396_v24 = vpop.f32.mrf.mxu0 }
  0xf8   : > { %531 = vmatmul.f32.gmra.mxu1 %v396_v24 }
  0xfd   : > { %v420_v25 = vpop.f32.mrf.mxu2 }
  0xfe   : > { %555 = vmatmul.f32.gmra.mxu3 %v420_v25 }
  0xff   : > { %v399_v26 = vpop.f32.mrf.mxu0 }
 0x100   : > { %534 = vmatmul.f32.gmra.mxu1 %v399_v26 }
 0x105   : > { %v423_v27 = vpop.f32.mrf.mxu2 }
 0x106   : > { %558 = vmatmul.f32.gmra.mxu3 %v423_v27 }
 0x107   : > { %v402_v28 = vpop.f32.mrf.mxu0 }
 0x108   : > { %537 = vmatmul.f32.gmra.mxu1 %v402_v28 }
 0x10d   : > { %v426_v29 = vpop.f32.mrf.mxu2 }
 0x10e   : > { %561 = vmatmul.f32.gmra.mxu3 %v426_v29 }
 0x10f   : > { %v405_v30 = vpop.f32.mrf.mxu0 }
 0x110   : > { %540 = vmatmul.f32.gmra.mxu1 %v405_v30 }
 0x115   : > { %v429_v31 = vpop.f32.mrf.mxu2 }
 0x116   : > { %564 = vmatmul.f32.gmra.mxu3 %v429_v31 }
 0x155   : > { %v520_v33 = vpop.f32.mrf.mxu1 }
 0x156   : > { %v1037_v34 = vadd.f32 %v809_v32, %v520_v33 }
 0x158   : > { %v568_v35 = vmax.f32 %v1037_v34, 0.0 }
 0x15d   : > { %v523_v36 = vpop.f32.mrf.mxu1 }
 0x15e   : > { %v1040_v37 = vadd.f32 %v809_v32, %v523_v36 }
 0x160   : > { %v569_v38 = vmax.f32 %v1040_v37, 0.0 }
 0x161   : > { %v544_v39 = vpop.f32.mrf.mxu3 }
 0x162   : > { %v1043_v40 = vadd.f32 %v809_v32, %v544_v39 }
 0x164   : > { %v576_v41 = vmax.f32 %v1043_v40, 0.0 }
 0x165   : > { %v526_v42 = vpop.f32.mrf.mxu1 }
 0x166   : > { %v1046_v43 = vadd.f32 %v809_v32, %v526_v42 }
 0x168   : > { %v570_v44 = vmax.f32 %v1046_v43, 0.0 }
 0x169   : > { %v547_v45 = vpop.f32.mrf.mxu3 }
 0x16a   : > { %v1049_v46 = vadd.f32 %v809_v32, %v547_v45 }
 0x16c   : > { %v577_v47 = vmax.f32 %v1049_v46, 0.0 }
 0x16d   : > { %v529_v48 = vpop.f32.mrf.mxu1 }
 0x16e   : > { %v530_v49 = vadd.f32 %v809_v32, %v529_v48 }
 0x170   : > { %v571_v50 = vmax.f32 %v530_v49, 0.0 }
 0x171   : > { %v550_v51 = vpop.f32.mrf.mxu3 }
 0x172   : > { %v551_v52 = vadd.f32 %v809_v32, %v550_v51 }
 0x174   : > { %v578_v53 = vmax.f32 %v551_v52, 0.0 }
 0x175   : > { %v532_v54 = vpop.f32.mrf.mxu1 }
 0x176   : > { %v533_v55 = vadd.f32 %v809_v32, %v532_v54 }
 0x178   : > { %v572_v56 = vmax.f32 %v533_v55, 0.0 }
 0x179   : > { %v553_v57 = vpop.f32.mrf.mxu3 }
 0x17a   : > { %v554_v58 = vadd.f32 %v809_v32, %v553_v57 }
 0x17c   : > { %v579_v59 = vmax.f32 %v554_v58, 0.0 }
 0x17d   : > { %v535_v60 = vpop.f32.mrf.mxu1 }
 0x17e   : > { %v536_v61 = vadd.f32 %v809_v32, %v535_v60 }
 0x180   : > { %v573_v62 = vmax.f32 %v536_v61, 0.0 }
 0x181   : > { %v556_v63 = vpop.f32.mrf.mxu3 }
 0x182   : > { %v557_v0 = vadd.f32 %v809_v32, %v556_v63 }
 0x184   : > { %v580_v1 = vmax.f32 %v557_v0, 0.0 }
 0x185   : > { %v538_v2 = vpop.f32.mrf.mxu1 }
 0x186   : > { %v539_v3 = vadd.f32 %v809_v32, %v538_v2 }
 0x188   : > { %v574_v4 = vmax.f32 %v539_v3, 0.0 }
 0x189   : > { %v559_v5 = vpop.f32.mrf.mxu3 }
 0x18a   : > { %v560_v6 = vadd.f32 %v809_v32, %v559_v5 }
 0x18c   : > { %v581_v7 = vmax.f32 %v560_v6, 0.0 }
 0x18d   : > { %v541_v8 = vpop.f32.mrf.mxu1 }
 0x18e   : > { %v542_v9 = vadd.f32 %v809_v32, %v541_v8 }
 0x190   : > { %v575_v10 = vmax.f32 %v542_v9, 0.0 }
 0x191   : > { %v562_v11 = vpop.f32.mrf.mxu3 }
 0x192   : > { %v563_v12 = vadd.f32 %v809_v32, %v562_v11 }
 0x194   : > { %v582_v13 = vmax.f32 %v563_v12, 0.0 }
 0x198   : > { %587 = sbr.rel (%p741_p6) target bundleno = 429 (0x1ad), region = 82 }
 0x199   : > { %v565_v14 = vpop.f32.mrf.mxu3 }
 0x19a   : > { %v566_v15 = vadd.f32 %v809_v32, %v565_v14 }
 0x19c   : > { %v583_v16 = vmax.f32 %v566_v15, 0.0 }
 0x19d   : > { %591 = vst [vmem:[%s590_s23] sm:$0xff] %v568_v35 }
 0x19e   : > { %592 = vst [vmem:[%s590_s23 + $0x8] sm:$0xff] %v569_v38 }
 0x19f   : > { %593 = vst [vmem:[%s590_s23 + $0x10] sm:$0xff] %v570_v44 }
 0x1a0   : > { %594 = vst [vmem:[%s590_s23 + $0x18] sm:$0xff] %v571_v50 }
 0x1a1   : > { %595 = vst [vmem:[%s590_s23 + $0x20] sm:$0xff] %v572_v56 }
 0x1a2   : > { %596 = vst [vmem:[%s590_s23 + $0x28] sm:$0xff] %v573_v62 }
 0x1a3   : > { %597 = vst [vmem:[%s590_s23 + $0x30] sm:$0xff] %v574_v4 }
 0x1a4   : > { %598 = vst [vmem:[%s590_s23 + $0x38] sm:$0xff] %v575_v10 }
 0x1a5   : > { %599 = vst [vmem:[%s590_s23 + $0x40] sm:$0xff] %v576_v41 }
 0x1a6   : > { %600 = vst [vmem:[%s590_s23 + $0x48] sm:$0xff] %v577_v47 }
 0x1a7   : > { %601 = vst [vmem:[%s590_s23 + $0x50] sm:$0xff] %v578_v53 }
 0x1a8   : > { %602 = vst [vmem:[%s590_s23 + $0x58] sm:$0xff] %v579_v59 }
 0x1a9   : > { %603 = vst [vmem:[%s590_s23 + $0x60] sm:$0xff] %v580_v1 }
 0x1aa   : > { %604 = vst [vmem:[%s590_s23 + $0x68] sm:$0xff] %v581_v7 }
 0x1ab   : > { %605 = vst [vmem:[%s590_s23 + $0x70] sm:$0xff] %v582_v13 }
 0x1ac   : > { %606 = vst [vmem:[%s590_s23 + $0x78] sm:$0xff] %v583_v16 }
 0x1ad PF: > { %p743_p7 = scmp.ne.s32.totalorder %s828_s15, 1 }
 0x1af   : > { %610 = sbr.rel (%p743_p7) target bundleno = 452 (0x1c4), region = 86 }
 0x1b4   : > { %611 = vst [vmem:[%s1132_s4] sm:$0xff] %v568_v35 }
 0x1b5   : > { %612 = vst [vmem:[%s1132_s4 + $0x8] sm:$0xff] %v569_v38 }
 0x1b6   : > { %613 = vst [vmem:[%s1132_s4 + $0x10] sm:$0xff] %v570_v44 }
 0x1b7   : > { %614 = vst [vmem:[%s1132_s4 + $0x18] sm:$0xff] %v571_v50 }
 0x1b8   : > { %615 = vst [vmem:[%s1132_s4 + $0x20] sm:$0xff] %v572_v56 }
 0x1b9   : > { %616 = vst [vmem:[%s1132_s4 + $0x28] sm:$0xff] %v573_v62 }
 0x1ba   : > { %617 = vst [vmem:[%s1132_s4 + $0x30] sm:$0xff] %v574_v4 }
 0x1bb   : > { %618 = vst [vmem:[%s1132_s4 + $0x38] sm:$0xff] %v575_v10 }
 0x1bc   : > { %619 = vst [vmem:[%s1132_s4 + $0x40] sm:$0xff] %v576_v41 }
 0x1bd   : > { %620 = vst [vmem:[%s1132_s4 + $0x48] sm:$0xff] %v577_v47 }
 0x1be   : > { %621 = vst [vmem:[%s1132_s4 + $0x50] sm:$0xff] %v578_v53 }
 0x1bf   : > { %622 = vst [vmem:[%s1132_s4 + $0x58] sm:$0xff] %v579_v59 }
 0x1c0   : > { %623 = vst [vmem:[%s1132_s4 + $0x60] sm:$0xff] %v580_v1 }
 0x1c1   : > { %624 = vst [vmem:[%s1132_s4 + $0x68] sm:$0xff] %v581_v7 }
 0x1c2   : > { %625 = vst [vmem:[%s1132_s4 + $0x70] sm:$0xff] %v582_v13 }
 0x1c3   : > { %626 = vst [vmem:[%s1132_s4 + $0x78] sm:$0xff] %v583_v16 }
 0x1c4 PF: > { %s14_s17 = sadd.s32 1, %s836_s17   ;;  %s1133_s15 = smov %s832_s16 }
 0x1c5   : > { %p11_p8 = scmp.ge.s32.totalorder %s14_s17, 4   ;;  %s1134_s16 = smov %s1136_s18 }
 0x1c7   :  { %13 = sbr.rel (!%p11_p8) target bundleno = 2 (0x2), region = 132 }
 0x1cc   :  { %649 = vsyncmov [#allocation5] }
 0x1cf   :  { %s650_s29 = vpop.sfrf %649 }
 0x1d0   :  { %p748_p9 = scmp.ne.s32.totalorder %s650_s29, 0 }
 0x1d2   :  { %654 = shalt.err (%p748_p9)  }
 0x1d3   :  { %656 = vsyncmov [#allocation5 + $0x1] }
 0x1d6   :  { %s657_s30 = vpop.sfrf %656 }
 0x1d7   :  { %p749_p10 = scmp.ne.s32.totalorder %s657_s30, 0 }
 0x1d9   :  { %661 = shalt.err (%p749_p10)  }

</bundles_post_ra>
